<compile_context>
chip_gen: v7x
topology: tpu7x:2x2x1
jax: 0.10.0
libtpu: 0.0.40
codegen_flags: <defaults>
</compile_context>

<pallas_src>
import math
import numpy as np
import jax
import jax.numpy as jnp
from jax.experimental import pallas as pl
from jax.experimental.pallas import tpu as pltpu

JITTER = 0.01

# bf16 MXU inputs (with f32 accumulation) halve DMA bytes and run the MXU at
# full rate, but need a tolerance sign-off first (GP variance has cancellation);
# keep f32 by default.
MXU_DTYPE = jnp.float32


# ------------------------------------------------------------------ host-side setup
# (mirrors the PyTorch __init__/update(); eigendecomposition + FFT are setup-time)

def gauss_kernel_fn(x):
    return math.exp(-(x ** 2) / 2.0)


def build_kernel_array(size, kernel, bandwidth=1.0):
    array = np.zeros(size)
    if size % 2 != 0:
        for i in range((size - 1) // 2):
            array[i] = kernel(float(i) / bandwidth)
        for i in range((size + 1) // 2):
            array[size - (i + 1)] = kernel(float(i + 1) / bandwidth)
    else:
        for i in range(size // 2):
            array[i] = kernel(float(i) / bandwidth)
        for i in range(size // 2):
            array[size - (i + 1)] = kernel(float(i + 1) / bandwidth)
    return array


def sym_circulant_matrix_eigen(vector):
    v_fft = np.real(np.fft.fft(vector))
    size = vector.shape[0]
    array = np.zeros([size, size])
    for i in range(size):
        this_vector = np.exp(-2j * np.pi * i * np.arange(size) / size)
        if i <= size // 2:
            array[:, i] = np.real(this_vector)
        else:
            array[:, i] = np.imag(this_vector)
    if size % 2 == 0:
        array[:, size // 2] *= np.sqrt(0.5)
    array *= np.sqrt(2.0) / np.sqrt(size)
    array[:, 0] *= 1.0 / np.sqrt(2.0)
    return v_fft, array


def se_kernel_np(X, X2, length_scale):
    X = X / length_scale
    X2 = X2 / length_scale
    Xn = np.sum(X * X, axis=1)[:, None]
    X2n = np.sum(X2 * X2, axis=1)[None, :]
    K = -2.0 * (X @ X2.T) + Xn + X2n
    return np.exp(K / -2.0)


# ------------------------------------------------------------------ SE kernel (Pallas)

def _se_kernel_body(x_ref, x2t_ref, o_ref):
    # x_ref: [N1, D] (pre-scaled), x2t_ref: [D, N2] (pre-scaled, pre-transposed)
    # o_ref: [N1, N2] = exp(-0.5 * ||x_i - x2_j||^2)
    x = x_ref[...]
    x2t = x2t_ref[...]
    n1, d = x.shape
    n2 = x2t.shape[1]
    xn = jnp.sum(x * x, axis=1, keepdims=True)             # [N1, 1]
    cross = jnp.zeros((n1, n2), dtype=jnp.float32)
    sq2 = jnp.zeros((1, n2), dtype=jnp.float32)
    # D is tiny (1..3): VPU outer-product broadcasts, no degenerate MXU matmul.
    for dd in range(d):
        row = x2t[dd:dd + 1, :]                            # [1, N2]
        cross = cross + x[:, dd:dd + 1] * row
        sq2 = sq2 + row * row
    o_ref[...] = jnp.exp(-0.5 * (xn - 2.0 * cross + sq2))


def se_kernel_pallas(x_scaled, x2_scaled):
    """exp(-0.5*||x_i - x2_j||^2) for per-dimension pre-scaled coordinates."""
    n1 = x_scaled.shape[0]
    n2 = x2_scaled.shape[0]
    # TODO(synk): tile over (n1, n2) for very large sensor counts; at realistic
    # sizes this call is negligible next to the predict matmul.
    return pl.pallas_call(
        _se_kernel_body,
        out_shape=jax.ShapeDtypeStruct((n1, n2), jnp.float32),
        in_specs=[pl.BlockSpec(memory_space=pltpu.MemorySpace.VMEM),
                  pl.BlockSpec(memory_space=pltpu.MemorySpace.VMEM)],
        out_specs=pl.BlockSpec(memory_space=pltpu.MemorySpace.VMEM),
    )(x_scaled.astype(jnp.float32), x2_scaled.T.astype(jnp.float32))


# ------------------------------------------------------------------ GP predict (Pallas)

def _pick_col_tile(m, cap=256):
    """Largest lane-aligned column tile <= cap dividing m (fallback: full width)."""
    if m <= cap:
        return m
    for t in range(cap, 0, -128):
        if t % 128 == 0 and m % t == 0:
            return t
    return m


def gp_predict_pallas(temporal_sv, spatial, V, s_row, w_row, sv,
                      *, col_tile_cap=256, vmem_limit_bytes=48 * 1024 * 1024):
    """Structured-GP posterior mean/variance.

      temporal_sv : [Nt_test, Nt]  sv * SE(test_time, train_time)   (SMEM table)
      spatial     : [Ns_test, Ns]  SE_latlon * SE_elev (test x train), VMEM resident
      V           : [M, M]         kron(E_t, E_s),  M = Nt*Ns
      s_row       : [1, M]         w * (V^T y)  (precomputed in update())
      w_row       : [1, M]         1 / (sv*lambda + nv)
    Returns out[Nt_test, Ns_test, 2]:  [...,0] = pred,  [...,1] = var.
    """
    nt_test, nt = temporal_sv.shape
    ns_test, ns = spatial.shape
    m = V.shape[0]
    assert V.shape == (m, m) and m == nt * ns
    assert s_row.shape == (1, m) and w_row.shape == (1, m)
    # The V tile's second-to-last block dim is Ns.
    # TODO(synk): pad V/spatial rows when Ns is not a multiple of 8.
    assert ns % 8 == 0 or ns == m, "Ns must be a multiple of 8 for the V BlockSpec"

    tn = _pick_col_tile(m, col_tile_cap)
    nj = m // tn
    assert nj * tn == m
    sv = float(sv)  # trace-time constant (folded into the kernel)

    def body(tker_ref, sker_ref, v_ref, s_ref, w_ref, out_ref,
             a_acc, pred_acc, var_acc):
        ti = pl.program_id(0)
        j = pl.program_id(1)
        tj = pl.program_id(2)
        n_j = pl.num_programs(1)
        n_tj = pl.num_programs(2)

        @pl.when(jnp.logical_and(j == 0, tj == 0))
        def _init_row_block():
            pred_acc[...] = jnp.zeros_like(pred_acc)
            var_acc[...] = jnp.zeros_like(var_acc)

        @pl.when(tj == 0)
        def _init_col_tile():
            a_acc[...] = jnp.zeros_like(a_acc)

        # Kronecker-fused K tile: rows = test time ti, cols = training time tj.
        t_scal = tker_ref[ti, tj]                          # scalar, already * sv
        k_tile = (t_scal * sker_ref[...]).astype(MXU_DTYPE)
        a_acc[...] += jnp.dot(k_tile, v_ref[...].astype(MXU_DTYPE),
                              preferred_element_type=jnp.float32)

        @pl.when(tj == n_tj - 1)
        def _reduce_col_tile():
            a = a_acc[...]                                 # [Ns_test, tn]
            pred_acc[...] += jnp.sum(a * s_ref[...], axis=1, keepdims=True)
            var_acc[...] += jnp.sum(a * a * w_ref[...], axis=1, keepdims=True)

        @pl.when(jnp.logical_and(j == n_j - 1, tj == n_tj - 1))
        def _finalize():
            out_ref[:, 0:1] = pred_acc[...]
            out_ref[:, 1:2] = jnp.maximum(sv - var_acc[...], 0.0)

    grid_spec = pltpu.PrefetchScalarGridSpec(
        num_scalar_prefetch=0,
        grid=(nt_test, nj, nt),                            # contraction axis last
        in_specs=[
            # small temporal table of scalars -> SMEM, indexed by program_id
            pl.BlockSpec(memory_space=pltpu.MemorySpace.SMEM),
            # test spatial kernel: VMEM-resident (constant block index)
            pl.BlockSpec((ns_test, ns), lambda ti, j, tj: (0, 0)),
            # eigenvector panel: rows = training time tj block, cols = j tile
            pl.BlockSpec((ns, tn), lambda ti, j, tj: (tj, j)),
            # s = w*(V^T y) and w, per column tile
            pl.BlockSpec((1, tn), lambda ti, j, tj: (0, j)),
            pl.BlockSpec((1, tn), lambda ti, j, tj: (0, j)),
        ],
        out_specs=pl.BlockSpec((None, ns_test, 2), lambda ti, j, tj: (ti, 0, 0)),
        scratch_shapes=[
            pltpu.VMEM((ns_test, tn), jnp.float32),        # A = K @ V column panel
            pltpu.VMEM((ns_test, 1), jnp.float32),         # pred partial
            pltpu.VMEM((ns_test, 1), jnp.float32),         # sum(A^2 w) partial
        ])

    return pl.pallas_call(
        body,
        out_shape=jax.ShapeDtypeStruct((nt_test, ns_test, 2), jnp.float32),
        grid_spec=grid_spec,
        compiler_params=pltpu.CompilerParams(
            # ti is independent across test time steps -> megacore-shardable on v7x
            dimension_semantics=("parallel", "arbitrary", "arbitrary"),
            # headroom under v7x's 64 MiB physical VMEM; well above actual use
            vmem_limit_bytes=vmem_limit_bytes),
    )(temporal_sv.astype(jnp.float32), spatial.astype(jnp.float32),
      V, s_row, w_row)


# ------------------------------------------------------------------ model

class GaussianModelPallas:
    def __init__(self, space_coordinates, time_coordinates, stData,
                 latlon_length_scale=4300.0, elevation_length_scale=30.0,
                 time_length_scale=0.25, noise_variance=0.1,
                 signal_variance=1.0, time_structured=True):
        assert time_structured, "only the time_structured=True forward path is implemented"
        self.space_coordinates = np.asarray(space_coordinates, dtype=np.float64)
        self.time_coordinates = np.asarray(time_coordinates, dtype=np.float64)
        self.stData = np.asarray(stData, dtype=np.float64)
        # nn.Parameter(log(...)) -- deterministic initialization
        self.log_latlon_length_scale = math.log(latlon_length_scale)
        self.log_elevation_length_scale = math.log(elevation_length_scale)
        self.log_time_length_scale = math.log(time_length_scale)
        self.log_noise_variance = math.log(noise_variance)
        self.log_signal_variance = math.log(signal_variance)
        self.update()

    def update(self):
        ll = math.exp(self.log_latlon_length_scale)
        el = math.exp(self.log_elevation_length_scale)
        tl = math.exp(self.log_time_length_scale)
        sv = math.exp(self.log_signal_variance)
        nv = math.exp(self.log_noise_variance)

        latlon_kernel = se_kernel_np(self.space_coordinates[:, 0:2],
                                     self.space_coordinates[:, 0:2], ll)
        elevation_kernel = se_kernel_np(self.space_coordinates[:, 2:3],
                                        self.space_coordinates[:, 2:3], el)
        spatial_kernel = (latlon_kernel * elevation_kernel
                          + np.eye(latlon_kernel.shape[0]) * JITTER)
        # TODO(synk): symmetric eigendecomposition / FFT have no Pallas equivalent;
        # they are setup-time (update()), done host-side in float64 numpy.
        eigen_value_s, eigen_vector_s = np.linalg.eigh(spatial_kernel)

        delta_time = float(self.time_coordinates[1, 0] - self.time_coordinates[0, 0])
        temporal_kernel_vector = build_kernel_array(
            self.time_coordinates.shape[0], gauss_kernel_fn, tl / delta_time)
        eigen_value_t, eigen_vector_t = sym_circulant_matrix_eigen(temporal_kernel_vector)

        V = np.kron(eigen_vector_t, eigen_vector_s)                      # [M, M]
        lam = np.kron(eigen_value_t, eigen_value_s)                      # [M]
        w = 1.0 / (sv * lam + nv)
        y = self.stData.T.reshape(-1)                                    # time-major
        s = w * (V.T @ y)          # training-only quantity, hoisted out of forward

        # device copies (f32)
        self.V_st = jnp.asarray(V, dtype=jnp.float32)
        self.w_row = jnp.asarray(w.reshape(1, -1), dtype=jnp.float32)
        self.s_row = jnp.asarray(s.reshape(1, -1), dtype=jnp.float32)
        # float64 copies kept for the numpy reference check
        self._V_np, self._w_np, self._y_np = V, w, y

    def forward(self, test_space_coordinates, test_time_coordinates):
        ll = math.exp(self.log_latlon_length_scale)
        el = math.exp(self.log_elevation_length_scale)
        tl = math.exp(self.log_time_length_scale)
        sv = math.exp(self.log_signal_variance)

        tsc = np.asarray(test_space_coordinates, dtype=np.float64)       # [Ns_test, 3]
        ttc = np.asarray(test_time_coordinates, dtype=np.float64)        # [Nt_test, 1]
        scale = np.array([ll, ll, el], dtype=np.float64)

        # Fused latlon*elevation SE kernel: per-dim scaling => exp(a)*exp(b)=exp(a+b).
        test_spatial = se_kernel_pallas(
            jnp.asarray(tsc / scale, dtype=jnp.float32),
            jnp.asarray(self.space_coordinates / scale, dtype=jnp.float32))
        test_temporal = se_kernel_pallas(
            jnp.asarray(ttc / tl, dtype=jnp.float32),
            jnp.asarray(self.time_coordinates / tl, dtype=jnp.float32))

        temporal_sv = sv * test_temporal  # fold signal variance into the kron scale

        out = gp_predict_pallas(temporal_sv, test_spatial, self.V_st,
                                self.s_row, self.w_row, sv)              # [Nt_test, Ns_test, 2]
        yPred = out[:, :, 0].T                                           # [Ns_test, Nt_test]
        yVar = out[:, :, 1].T
        status = [f"{self.stData.shape[0]} sensors" for _ in range(ttc.shape[0])]
        return yPred, yVar, status


# ------------------------------------------------------------------ main

if __name__ == "__main__":
    key = jax.random.PRNGKey(0)
    k1, k2, k3 = jax.random.split(key, 3)

    Ns, Nt = 32, 16            # training sensors / time steps  (M = 512)
    Ns_test, Nt_test = 8, 8    # test sensors / time steps      (Mt = 64)

    coord_scale = np.array([4300.0, 4300.0, 30.0])
    space = np.asarray(jax.random.normal(k1, (Ns, 3)), dtype=np.float64) * coord_scale
    time = (np.arange(Nt, dtype=np.float64) * 0.25).reshape(Nt, 1)
    stData = np.asarray(jax.random.normal(k2, (Ns, Nt)), dtype=np.float64)

    test_space = np.asarray(jax.random.normal(k3, (Ns_test, 3)), dtype=np.float64) * coord_scale
    test_time = (np.arange(Nt_test, dtype=np.float64) * 0.25 + 0.125).reshape(Nt_test, 1)

    model = GaussianModelPallas(space, time, stData)
    yPred, yVar, status = model.forward(test_space, test_time)
    jax.block_until_ready((yPred, yVar))

    assert yPred.shape == (Ns_test, Nt_test)
    assert yVar.shape == (Ns_test, Nt_test)
    assert len(status) == Nt_test and status[0] == f"{Ns} sensors"

    # float64 numpy reference of the PyTorch forward path
    ll = math.exp(model.log_latlon_length_scale)
    el = math.exp(model.log_elevation_length_scale)
    tl = math.exp(model.log_time_length_scale)
    sv = math.exp(model.log_signal_variance)
    t_spatial_ref = (se_kernel_np(test_space[:, 0:2], space[:, 0:2], ll)
                     * se_kernel_np(test_space[:, 2:3], space[:, 2:3], el))
    t_temporal_ref = se_kernel_np(test_time, time, tl)
    K_ref = sv * np.kron(t_temporal_ref, t_spatial_ref)
    A_ref = K_ref @ model._V_np
    s_ref = model._w_np * (model._V_np.T @ model._y_np)
    pred_ref = A_ref @ s_ref
    var_ref = sv - np.einsum('ij,j,ij->i', A_ref, model._w_np, A_ref)
    yPred_ref = pred_ref.reshape(Nt_test, Ns_test).T
    yVar_ref = np.maximum(var_ref, 0.0).reshape(Nt_test, Ns_test).T
    np.testing.assert_allclose(np.asarray(yPred), yPred_ref, rtol=5e-3, atol=5e-3)
    np.testing.assert_allclose(np.asarray(yVar), yVar_ref, rtol=5e-3, atol=5e-3)

    print("KERNEL_OK")
</pallas_src>

<mosaic_0001>
module attributes {stable_mosaic.version = 11 : i64} {
  func.func @_se_kernel_body(%arg0: memref<8x3xf32, #tpu.memory_space<vmem>>, %arg1: memref<3x32xf32, #tpu.memory_space<vmem>>, %arg2: memref<8x32xf32, #tpu.memory_space<vmem>>) attributes {dimension_semantics = [], scalar_prefetch = 0 : i64, scratch_operands = 0 : i64, tpu.core_type = #tpu.core_type<tc>} {
    %c0 = arith.constant 0 : index
    %c0_0 = arith.constant 0 : index
    %0 = vector.load %arg0[%c0, %c0_0] : memref<8x3xf32, #tpu.memory_space<vmem>>, vector<8x3xf32>
    %c0_1 = arith.constant 0 : index
    %c0_2 = arith.constant 0 : index
    %1 = vector.load %arg1[%c0_1, %c0_2] : memref<3x32xf32, #tpu.memory_space<vmem>>, vector<3x32xf32>
    %2 = arith.mulf %0, %0 : vector<8x3xf32>
    %cst = arith.constant dense<0.000000e+00> : vector<8xf32>
    %3 = vector.multi_reduction <add>, %2, %cst [1] : vector<8x3xf32> to vector<8xf32>
    %4 = vector.shape_cast %3 : vector<8xf32> to vector<8x1xf32>
    %cst_3 = arith.constant 0.000000e+00 : f32
    %5 = vector.broadcast %cst_3 : f32 to vector<8x32xf32>
    %cst_4 = arith.constant 0.000000e+00 : f32
    %6 = vector.broadcast %cst_4 : f32 to vector<1x32xf32>
    %7 = vector.extract_strided_slice %1 {offsets = [0, 0], sizes = [1, 32], strides = [1, 1]} : vector<3x32xf32> to vector<1x32xf32>
    %8 = vector.extract_strided_slice %0 {offsets = [0, 0], sizes = [8, 1], strides = [1, 1]} : vector<8x3xf32> to vector<8x1xf32>
    %9 = vector.broadcast %8 : vector<8x1xf32> to vector<8x32xf32>
    %10 = vector.broadcast %7 : vector<1x32xf32> to vector<8x32xf32>
    %11 = arith.mulf %9, %10 : vector<8x32xf32>
    %12 = arith.addf %5, %11 : vector<8x32xf32>
    %13 = arith.mulf %7, %7 : vector<1x32xf32>
    %14 = arith.addf %6, %13 : vector<1x32xf32>
    %15 = vector.extract_strided_slice %1 {offsets = [1, 0], sizes = [1, 32], strides = [1, 1]} : vector<3x32xf32> to vector<1x32xf32>
    %16 = vector.extract_strided_slice %0 {offsets = [0, 1], sizes = [8, 1], strides = [1, 1]} : vector<8x3xf32> to vector<8x1xf32>
    %17 = vector.broadcast %16 : vector<8x1xf32> to vector<8x32xf32>
    %18 = vector.broadcast %15 : vector<1x32xf32> to vector<8x32xf32>
    %19 = arith.mulf %17, %18 : vector<8x32xf32>
    %20 = arith.addf %12, %19 : vector<8x32xf32>
    %21 = arith.mulf %15, %15 : vector<1x32xf32>
    %22 = arith.addf %14, %21 : vector<1x32xf32>
    %23 = vector.extract_strided_slice %1 {offsets = [2, 0], sizes = [1, 32], strides = [1, 1]} : vector<3x32xf32> to vector<1x32xf32>
    %24 = vector.extract_strided_slice %0 {offsets = [0, 2], sizes = [8, 1], strides = [1, 1]} : vector<8x3xf32> to vector<8x1xf32>
    %25 = vector.broadcast %24 : vector<8x1xf32> to vector<8x32xf32>
    %26 = vector.broadcast %23 : vector<1x32xf32> to vector<8x32xf32>
    %27 = arith.mulf %25, %26 : vector<8x32xf32>
    %28 = arith.addf %20, %27 : vector<8x32xf32>
    %29 = arith.mulf %23, %23 : vector<1x32xf32>
    %30 = arith.addf %22, %29 : vector<1x32xf32>
    %cst_5 = arith.constant 2.000000e+00 : f32
    %31 = vector.broadcast %cst_5 : f32 to vector<8x32xf32>
    %32 = arith.mulf %31, %28 : vector<8x32xf32>
    %33 = vector.broadcast %4 : vector<8x1xf32> to vector<8x32xf32>
    %34 = arith.subf %33, %32 : vector<8x32xf32>
    %35 = vector.broadcast %30 : vector<1x32xf32> to vector<8x32xf32>
    %36 = arith.addf %34, %35 : vector<8x32xf32>
    %cst_6 = arith.constant -5.000000e-01 : f32
    %37 = vector.broadcast %cst_6 : f32 to vector<8x32xf32>
    %38 = arith.mulf %37, %36 : vector<8x32xf32>
    %39 = math.exp %38 : vector<8x32xf32>
    %c0_7 = arith.constant 0 : index
    %c0_8 = arith.constant 0 : index
    %40 = vector.load %arg2[%c0_7, %c0_8] : memref<8x32xf32, #tpu.memory_space<vmem>>, vector<8x32xf32>
    tpu.vector_store %arg2[%c0_7, %c0_8], %39 {strides = array<i32>} : memref<8x32xf32, #tpu.memory_space<vmem>>, vector<8x32xf32>,
    return
  }
}

</mosaic_0001>

<bundles_post_ra>
// kernel: tpu_custom_call.1
= control target key start
LH: loop header
LB: loop body
LE: loop exit
PB: predicated region body
PF: predicated region fallthrough
CT: control target
= control target key end

     0   :  { %vm15_vm0 = vcmask 23552   ;;  %v119_v2 = vmov 0   ;;  %v120_v3 = vmov 2   ;;  %s156_s0 = inlined_call_operand.vmem [shape: f32[8,3], index: 0, kind: input, shape index: {}]   ;;  %s157_s1 = inlined_call_operand.vmem [shape: f32[3,32], index: 1, kind: input, shape index: {}]   ;;  %s158_s2 = inlined_call_operand.hbm [shape: f32[8,32], index: 2, kind: output, shape index: {}]  }
   0x1   :  { %v12_v0 = vld [vmem:[%s156_s0] sm:$0xff]  ;;  %89 = vset.pattern.permute.xlu0 %v119_v2  ;;  %91 = vset.pattern.permute.xlu1 %v120_v3 }
   0x2   :  { %v14_v1 = vmul.f32 %v12_v0, %v12_v0 }
   0x3   :  { %7 = vsyncpa [#allocation3], 0  ;;  %21 = vperm.xlu0 %89, %v12_v0   ;;  %v121_v5 = vmov 1   ;;  %v24_v6 = vlaneseq  ;;  %v13_v8 = vld [vmem:[%s157_s1] sm:$0x7]  ;;  %s122_s0 = smov [#allocation2]  }
   0x4   :  { %v16_v4 = vsel %vm15_vm0, %v14_v1, 0.0  ;;  %v30_v11 = vmul.f32 %v13_v8, %v13_v8  ;;  %s77_s1 = sshll.u32 %s122_s0, 4  ;;  %vm69_vm1 = vcmask 261120   ;;  %s78_s1 = int_to_ptr.vmem [resolvable:$true] %s77_s1 }
   0x5   :  { %17 = vadd.xlane.f32.xlu1 %v16_v4  ;;  %v25_v7 = vshrl.u32 %v24_v6, 7  ;;  %s95_s13 = scalar_lea.vmem %s78_s1, 128  ;;  %p100_p1 = scmp.lt.s32.totalorder %s78_s1, %s78_s1 }
   0x6   :  { %v43_v14 = vrot.slane %v30_v11, 1  ;;  %v56_v18 = vrot.slane %v30_v11, 2  ;;  %p96_p0 = scmp.ne.s32.totalorder %s78_s1, %s95_s13  ;;  %p101_p2 = scmp.lt.s32.totalorder %s95_s13, %s95_s13 }
   0x7   :  { %90 = vset.pattern.permute.xlu0 %v121_v5  ;;  %v26_v10 = vsub.s32 0, %v25_v7  ;;  %v38_v12 = vsub.s32 1, %v25_v7  ;;  %v52_v16 = vsub.s32 2, %v25_v7 }
   0x8   :  { %33 = vperm.xlu0 %90, %v12_v0   ;;  %v45_v20 = vadd.f32 %v43_v14, %v30_v11  ;;  %p102_p3 = por %p101_p2, %p100_p1 }
   0x9   :  { %v27_v13 = vrot.slane %v13_v8, %v26_v10  ;;  %v39_v15 = vrot.slane %v13_v8, %v38_v12  ;;  %v53_v23 = vrot.slane %v13_v8, %v52_v16 }
   0xa   :  { %v58_v25 = vadd.f32 %v56_v18, %v45_v20  ;;  %p103_p4 = pnand %p102_p3, %p96_p0 }
   0xc   :  { %92 = vset.pattern.permute.xlu0 %v120_v3  ;;  %v64_v29 = vrot.slane %v58_v25, %v26_v10 }
  0x16   :  { %47 = vperm.xlu1 %91, %v12_v0  }
  0x82   :  { %v22_v9 = vpop.permute.xlu0 %21 }
  0x83   :  { %v28_v21 = vmul.f32 %v27_v13, %v22_v9 }
  0x87   :  { %v34_v17 = vpop.permute.xlu0 %33 }
  0x88   :  { %v40_v22 = vmul.f32 %v39_v15, %v34_v17 }
  0x8a   :  { %v41_v26 = vadd.f32 %v40_v22, %v28_v21 }
  0x92   :  { %v18_v19 = vpop.xlane.xlu1 %17 }
  0x96   :  { %v48_v24 = vpop.permute.xlu1 %47 }
  0x97   :  { %v54_v27 = vmul.f32 %v53_v23, %v48_v24 }
  0x99   :  { %v55_v28 = vadd.f32 %v54_v27, %v41_v26 }
  0x9b   :  { %v59_v30 = vmul.f32 2.0, %v55_v28 }
  0x9d   :  { %v60_v31 = vsub.f32 %v18_v19, %v59_v30 }
  0x9f   :  { %v65_v32 = vadd.f32 %v64_v29, %v60_v31 }
  0xa1   :  { %v66_v33 = vmul.f32 -0.5, %v65_v32 }
  0xa3   :  { %v67_v34 = vmul.f32 1.442695, %v66_v33 }
  0xa5   :  { %93 = vpow2.f32 %v67_v34 }
  0xaf   :  { %v94_v35 = vpop.eup %93 }
  0xb0   :  { %70 = vst.msk [vmem:[#allocation2] sm:$0xff] %vm69_vm1, %v94_v35 }
  0xb1   :  { %106 = shalt.err (!%p103_p4)
}
  0xb2   :  { %s107_s16 = scalar_lea.hbm %s158_s2, 128 }
  0xb3   :  { %p108_p5 = scmp.ne.s32.totalorder %s158_s2, %s107_s16  ;;  %p111_p6 = scmp.lt.u32.totalorder %s107_s16, %s158_s2 }
  0xb5   :  { %p113_p7 = pnand %p111_p6, %p108_p5 }
  0xb7   :  { %116 = shalt.err (!%p113_p7)
}
  0xb8   :  { %80 = dma.vmem_to_hbm [thread:$0]  %s78_s1, 128, %s158_s2, [#allocation3]  }
  0xb9   :  { %117 = dma.done.wait [#allocation3], 128  }
  0xba   :  { %118 = vsyncadd [#allocation3], 4294967168 }
  0xbb   :  { %84 = vsyncpa [#allocation3], 1 }

</bundles_post_ra>
